<compile_context>
chip_gen: v5e
topology: v5e:2x2
jax: 0.10.0
libtpu: 0.0.40
codegen_flags: <defaults>
</compile_context>

<pallas_src>
import jax
import jax.numpy as jnp
from jax.experimental import pallas as pl
from jax.experimental.pallas import tpu as pltpu


# ---------------------------------------------------------------------------
# DCT matrices (torch_dct conventions, norm=None)
#   dct(x)[k]  = sum_n 2*cos(pi*(2n+1)*k/(2N)) * x[n]     (DCT-II, scale 2)
#   idct       = exact inverse of dct (row 0 scaled by 1/(4N), others 1/(2N))
# ---------------------------------------------------------------------------
def make_dct_matrices(n: int):
    k = jnp.arange(n, dtype=jnp.float32)[:, None]                 # (N, 1)
    m = jnp.arange(n, dtype=jnp.float32)[None, :]                 # (1, N)
    d = 2.0 * jnp.cos(jnp.pi * (2.0 * m + 1.0) * k / (2.0 * n))   # D[k, n]
    m_dct = d.T                                                   # x @ m_dct  = DCT-II(x)
    scale = jnp.full((n,), 1.0 / (2.0 * n), jnp.float32).at[0].set(1.0 / (4.0 * n))
    m_idct = scale[:, None] * d                                   # X @ m_idct = IDCT(X)
    return m_dct.astype(jnp.float32), m_idct.astype(jnp.float32)


# ---------------------------------------------------------------------------
# Pallas kernel — original row-major layout, two tensors fused in one launch.
#   p_ref, q_ref : (TILE_ROWS, mfcc_dim)
#   w1_ref       : (mfcc_dim, spectral_dim)   = -M_idct[:mfcc_dim, :]
#   w2_ref       : (spectral_dim, mfcc_dim)   = noise[:, None] * M_dct[:, :mfcc_dim]
#   out = x + exp(x @ W1) @ W2
# ---------------------------------------------------------------------------
def _attack_kernel(p_ref, q_ref, w1_ref, w2_ref, p_out_ref, q_out_ref):
    w1 = w1_ref[...]
    w2 = w2_ref[...]

    def attack(x):
        inv_spec = jnp.exp(jnp.dot(x, w1, preferred_element_type=jnp.float32))
        return x + jnp.dot(inv_spec, w2, preferred_element_type=jnp.float32)

    p_out_ref[...] = attack(p_ref[...])
    q_out_ref[...] = attack(q_ref[...])


def _choose_row_tile(rows: int):
    """Single grid step for small inputs; tile at 8192 rows for large ones."""
    MAX_TILE = 8192
    if rows <= MAX_TILE:
        return rows, 1                 # tile == full dim is always a legal block
    return MAX_TILE, pl.cdiv(rows, MAX_TILE)   # partial last block handled by Pallas


def spectral_attack_pq(p_means, q_means, noise_root, spectral_dim):
    """Attacked means for p and q in a single pallas_call (same shapes assumed)."""
    assert p_means.shape == q_means.shape
    lead = p_means.shape[:-1]
    mfcc_dim = p_means.shape[-1]
    rows = 1
    for d in lead:
        rows *= int(d)

    # Constant folded matrices (tiny; built once per trace).
    m_dct, m_idct = make_dct_matrices(spectral_dim)
    noise = jnp.exp(noise_root.astype(jnp.float32))
    w1 = -m_idct[:mfcc_dim, :]                       # (mfcc_dim, spectral_dim)
    w2 = noise[:, None] * m_dct[:, :mfcc_dim]        # (spectral_dim, mfcc_dim)

    # Free reshapes (contiguous collapse of leading dims), no transpose / pad / concat.
    xp = p_means.reshape(rows, mfcc_dim).astype(jnp.float32)
    xq = q_means.reshape(rows, mfcc_dim).astype(jnp.float32)

    tile, n_tiles = _choose_row_tile(rows)

    # VMEM budget derived from the actual tiles (double-buffered p/q in+out blocks
    # plus the (tile, spectral) intermediates), with headroom; never the flat 48 MiB.
    tile_bytes = 2 * (4 * tile * mfcc_dim * 4) + 2 * (tile * spectral_dim * 4)
    vmem_limit = int(max(4 << 20, min(32 << 20, 3 * tile_bytes)))

    cost = pl.CostEstimate(
        flops=2 * rows * (4 * mfcc_dim * spectral_dim + mfcc_dim),
        transcendentals=2 * rows * spectral_dim,
        bytes_accessed=2 * rows * mfcc_dim * 4 * 2,
    )

    pa, qa = pl.pallas_call(
        _attack_kernel,
        out_shape=(
            jax.ShapeDtypeStruct((rows, mfcc_dim), jnp.float32),
            jax.ShapeDtypeStruct((rows, mfcc_dim), jnp.float32),
        ),
        grid_spec=pltpu.PrefetchScalarGridSpec(
            num_scalar_prefetch=0,
            grid=(n_tiles,),
            in_specs=[
                pl.BlockSpec((tile, mfcc_dim), lambda i: (i, 0)),
                pl.BlockSpec((tile, mfcc_dim), lambda i: (i, 0)),
                # Constant index_map -> folded DCT matrices stay VMEM-resident.
                pl.BlockSpec((mfcc_dim, spectral_dim), lambda i: (0, 0)),
                pl.BlockSpec((spectral_dim, mfcc_dim), lambda i: (0, 0)),
            ],
            out_specs=[
                pl.BlockSpec((tile, mfcc_dim), lambda i: (i, 0)),
                pl.BlockSpec((tile, mfcc_dim), lambda i: (i, 0)),
            ],
        ),
        compiler_params=pltpu.CompilerParams(
            # Grid is a serial loop over independent row tiles; for very large
            # workloads on v7x this axis could be promoted to CORE_PARALLEL.
            dimension_semantics=("arbitrary",),
            vmem_limit_bytes=vmem_limit,
        ),
        cost_estimate=cost,
    )(xp, xq, w1, w2)

    return pa.reshape(*lead, mfcc_dim), qa.reshape(*lead, mfcc_dim)


# ---------------------------------------------------------------------------
# Pure-JAX reference (mirrors the PyTorch forward attack portion, unfused)
# ---------------------------------------------------------------------------
def reference_attack_means(means, noise_root, spectral_dim):
    s, f, mfcc_dim = means.shape
    m_dct, m_idct = make_dct_matrices(spectral_dim)
    noise = jnp.exp(noise_root)
    padded = jnp.concatenate(
        [means, jnp.zeros((s, f, spectral_dim - mfcc_dim), jnp.float32)], axis=2)
    log_spec = padded @ m_idct
    spec = jnp.exp(log_spec)
    attacked_spec = noise / spec
    attacked_padded = attacked_spec @ m_dct
    return means + attacked_padded[..., :mfcc_dim]


def forward(p_means, p_covariances, q_means, q_covariances, num_phones_mask,
            noise_root, spectral_dim):
    """Pallas-backed attack step of Spectral_attack_Taylor1_init.forward."""
    p_attacked, q_attacked = spectral_attack_pq(p_means, q_means, noise_root,
                                                spectral_dim)
    # TODO(synk): `torch.load(trained_model_path)` grading model is an opaque
    # checkpoint with unknown architecture — not translatable; return the
    # attacked means (plus passthrough args) instead.
    return p_attacked, q_attacked, p_covariances, q_covariances, num_phones_mask


if __name__ == "__main__":
    # Small, module-consistent shapes.
    num_speakers, num_feats = 2, 64
    mfcc_dim, spectral_dim = 16, 32

    key = jax.random.PRNGKey(0)
    k1, k2, k3, k4, k5 = jax.random.split(key, 5)
    p_means = 0.1 * jax.random.normal(k1, (num_speakers, num_feats, mfcc_dim), jnp.float32)
    q_means = 0.1 * jax.random.normal(k2, (num_speakers, num_feats, mfcc_dim), jnp.float32)
    p_cov = 0.1 * jax.random.normal(k3, (num_speakers, num_feats, mfcc_dim, mfcc_dim), jnp.float32)
    q_cov = 0.1 * jax.random.normal(k4, (num_speakers, num_feats, mfcc_dim, mfcc_dim), jnp.float32)
    num_phones_mask = jnp.ones((num_speakers, num_feats), jnp.float32)
    # deterministic parameter init (init_root in the original module)
    noise_root = 0.05 * jax.random.normal(k5, (spectral_dim,), jnp.float32)

    # Sanity: idct is the exact inverse of dct (norm=None conventions).
    m_dct, m_idct = make_dct_matrices(spectral_dim)
    assert jnp.allclose(m_dct @ m_idct, jnp.eye(spectral_dim, dtype=jnp.float32),
                        atol=1e-4)

    p_att, q_att, _, _, _ = forward(p_means, p_cov, q_means, q_cov,
                                    num_phones_mask, noise_root, spectral_dim)
    jax.block_until_ready((p_att, q_att))

    # Correctness check against the pure-JAX reference.
    p_ref = reference_attack_means(p_means, noise_root, spectral_dim)
    q_ref = reference_attack_means(q_means, noise_root, spectral_dim)
    assert jnp.allclose(p_att, p_ref, rtol=1e-4, atol=1e-4)
    assert jnp.allclose(q_att, q_ref, rtol=1e-4, atol=1e-4)

    print("KERNEL_OK")
</pallas_src>

<mosaic_0001>
module attributes {stable_mosaic.version = 11 : i64} {
  func.func @_attack_kernel(%arg0: i32, %arg1: memref<128x16xf32, #tpu.memory_space<vmem>>, %arg2: memref<128x16xf32, #tpu.memory_space<vmem>>, %arg3: memref<16x32xf32, #tpu.memory_space<vmem>>, %arg4: memref<32x16xf32, #tpu.memory_space<vmem>>, %arg5: memref<128x16xf32, #tpu.memory_space<vmem>>, %arg6: memref<128x16xf32, #tpu.memory_space<vmem>>) attributes {dimension_semantics = [#tpu.dimension_semantics<arbitrary>], iteration_bounds = array<i64: 1>, scalar_prefetch = 0 : i64, scratch_operands = 0 : i64, tpu.core_type = #tpu.core_type<tc>, window_params = [{transform_indices = @transform_0, window_bounds = array<i64: 128, 16>}, {transform_indices = @transform_1, window_bounds = array<i64: 128, 16>}, {pipeline_mode = #tpu.pipeline_mode<synchronous>, transform_indices = @transform_2, window_bounds = array<i64: 16, 32>}, {pipeline_mode = #tpu.pipeline_mode<synchronous>, transform_indices = @transform_3, window_bounds = array<i64: 32, 16>}, {transform_indices = @transform_4, window_bounds = array<i64: 128, 16>}, {transform_indices = @transform_5, window_bounds = array<i64: 128, 16>}]} {
    %c0 = arith.constant 0 : index
    %c0_0 = arith.constant 0 : index
    %0 = vector.load %arg3[%c0, %c0_0] : memref<16x32xf32, #tpu.memory_space<vmem>>, vector<16x32xf32>
    %c0_1 = arith.constant 0 : index
    %c0_2 = arith.constant 0 : index
    %1 = vector.load %arg4[%c0_1, %c0_2] : memref<32x16xf32, #tpu.memory_space<vmem>>, vector<32x16xf32>
    %c0_3 = arith.constant 0 : index
    %c0_4 = arith.constant 0 : index
    %2 = vector.load %arg1[%c0_3, %c0_4] : memref<128x16xf32, #tpu.memory_space<vmem>>, vector<128x16xf32>
    %cst = arith.constant dense<0.000000e+00> : vector<128x32xf32>
    %3 = tpu.matmul %2, %0, %cst {dimension_numbers = #tpu.dot_dimension_numbers<[1], [0], [0], [1], [0, 0, 1, 1], [], []>} : vector<128x16xf32>, vector<16x32xf32>, vector<128x32xf32> -> vector<128x32xf32>
    %4 = math.exp %3 : vector<128x32xf32>
    %cst_5 = arith.constant dense<0.000000e+00> : vector<128x16xf32>
    %5 = tpu.matmul %4, %1, %cst_5 {dimension_numbers = #tpu.dot_dimension_numbers<[1], [0], [0], [1], [0, 0, 1, 1], [], []>} : vector<128x32xf32>, vector<32x16xf32>, vector<128x16xf32> -> vector<128x16xf32>
    %6 = arith.addf %2, %5 : vector<128x16xf32>
    %c0_6 = arith.constant 0 : index
    %c0_7 = arith.constant 0 : index
    %7 = vector.load %arg5[%c0_6, %c0_7] : memref<128x16xf32, #tpu.memory_space<vmem>>, vector<128x16xf32>
    tpu.vector_store %arg5[%c0_6, %c0_7], %6 {strides = array<i32>} : memref<128x16xf32, #tpu.memory_space<vmem>>, vector<128x16xf32>,
    %c0_8 = arith.constant 0 : index
    %c0_9 = arith.constant 0 : index
    %8 = vector.load %arg2[%c0_8, %c0_9] : memref<128x16xf32, #tpu.memory_space<vmem>>, vector<128x16xf32>
    %cst_10 = arith.constant dense<0.000000e+00> : vector<128x32xf32>
    %9 = tpu.matmul %8, %0, %cst_10 {dimension_numbers = #tpu.dot_dimension_numbers<[1], [0], [0], [1], [0, 0, 1, 1], [], []>} : vector<128x16xf32>, vector<16x32xf32>, vector<128x32xf32> -> vector<128x32xf32>
    %10 = math.exp %9 : vector<128x32xf32>
    %cst_11 = arith.constant dense<0.000000e+00> : vector<128x16xf32>
    %11 = tpu.matmul %10, %1, %cst_11 {dimension_numbers = #tpu.dot_dimension_numbers<[1], [0], [0], [1], [0, 0, 1, 1], [], []>} : vector<128x32xf32>, vector<32x16xf32>, vector<128x16xf32> -> vector<128x16xf32>
    %12 = arith.addf %8, %11 : vector<128x16xf32>
    %c0_12 = arith.constant 0 : index
    %c0_13 = arith.constant 0 : index
    %13 = vector.load %arg6[%c0_12, %c0_13] : memref<128x16xf32, #tpu.memory_space<vmem>>, vector<128x16xf32>
    tpu.vector_store %arg6[%c0_12, %c0_13], %12 {strides = array<i32>} : memref<128x16xf32, #tpu.memory_space<vmem>>, vector<128x16xf32>,
    return
  }
  func.func @transform_0(%arg0: i32) -> (i32, i32) {
    %c0_i32 = arith.constant 0 : i32
    %c0_i32_0 = arith.constant 0 : i32
    return %arg0, %c0_i32 : i32, i32
  }
  func.func @transform_1(%arg0: i32) -> (i32, i32) {
    %c0_i32 = arith.constant 0 : i32
    %c0_i32_0 = arith.constant 0 : i32
    return %arg0, %c0_i32 : i32, i32
  }
  func.func @transform_2(%arg0: i32) -> (i32, i32) {
    %c0_i32 = arith.constant 0 : i32
    %c0_i32_0 = arith.constant 0 : i32
    %c0_i32_1 = arith.constant 0 : i32
    return %c0_i32, %c0_i32_0 : i32, i32
  }
  func.func @transform_3(%arg0: i32) -> (i32, i32) {
    %c0_i32 = arith.constant 0 : i32
    %c0_i32_0 = arith.constant 0 : i32
    %c0_i32_1 = arith.constant 0 : i32
    return %c0_i32, %c0_i32_0 : i32, i32
  }
  func.func @transform_4(%arg0: i32) -> (i32, i32) {
    %c0_i32 = arith.constant 0 : i32
    %c0_i32_0 = arith.constant 0 : i32
    return %arg0, %c0_i32 : i32, i32
  }
  func.func @transform_5(%arg0: i32) -> (i32, i32) {
    %c0_i32 = arith.constant 0 : i32
    %c0_i32_0 = arith.constant 0 : i32
    return %arg0, %c0_i32 : i32, i32
  }
}

</mosaic_0001>

<bundles_post_ra>
// kernel: tpu_custom_call.1
= control target key start
LH: loop header
LB: loop body
LE: loop exit
PB: predicated region body
PF: predicated region fallthrough
CT: control target
= control target key end

     0   :  { %vm41_vm0 = vcmask 130048   ;;  %vm187_vm1 = vcmask 261120   ;;  %s1239_s2 = inlined_call_operand.vmem [shape: f32[16,32], index: 2, kind: input, shape index: {}]   ;;  %s1240_s1 = inlined_call_operand.vmem [shape: f32[128,16], index: 1, kind: input, shape index: {}]   ;;  %s1241_s0 = inlined_call_operand.vmem [shape: f32[128,16], index: 0, kind: input, shape index: {}]   ;;  %s1242_s3 = inlined_call_operand.vmem [shape: f32[32,16], index: 3, kind: input, shape index: {}]   ;;  %s1243_s4 = inlined_call_operand.vmem [shape: f32[128,16], index: 4, kind: output, shape index: {0}]   ;;  %s1244_s5 = inlined_call_operand.vmem [shape: f32[128,16], index: 5, kind: output, shape index: {1}]  }
   0x1   :  { %v20_v0 = vld [vmem:[%s1239_s2 + $0x8] sm:$0xff]  ;;  %v19_v1 = vld [vmem:[%s1239_s2] sm:$0xff]  ;;  %v842_v6 = vld [vmem:[%s1240_s1 + $0x10] sm:$0xff] }
   0x2   :  { %411 = vmatpush.msra.mxu2 %v20_v0  ;;  %v814_v2 = vld [vmem:[%s1240_s1] sm:$0xff]  ;;  %104 = vmatpush.msra.mxu0 %v20_v0  ;;  %v828_v4 = vld [vmem:[%s1240_s1 + $0x8] sm:$0xff]  ;;  %v847_v7 = vld [vmem:[%s1241_s0 + $0x10] sm:$0xff] }
   0x3   :  { %v819_v3 = vld [vmem:[%s1241_s0] sm:$0xff]  ;;  %v833_v5 = vld [vmem:[%s1241_s0 + $0x8] sm:$0xff]  ;;  %v856_v8 = vld [vmem:[%s1240_s1 + $0x18] sm:$0xff] }
   0x4   :  { %412 = vmatpush.msra.mxu2 %v19_v1  ;;  %105 = vmatpush.msra.mxu0 %v19_v1  ;;  %v861_v9 = vld [vmem:[%s1241_s0 + $0x18] sm:$0xff]  ;;  %v870_v10 = vld [vmem:[%s1240_s1 + $0x20] sm:$0xff]  ;;  %v884_v12 = vld [vmem:[%s1240_s1 + $0x28] sm:$0xff] }
   0x5   :  { %679 = vmatmul.msk.f32.vlgmr.msra.gmra.mxu2 %vm41_vm0, %v814_v2  ;;  %647 = vmatmul.msk.f32.vlgmr.msra.gmra.mxu0 %vm41_vm0, %v819_v3  ;;  %v875_v11 = vld [vmem:[%s1241_s0 + $0x20] sm:$0xff]  ;;  %v889_v13 = vld [vmem:[%s1241_s0 + $0x28] sm:$0xff]  ;;  %v898_v14 = vld [vmem:[%s1240_s1 + $0x30] sm:$0xff] }
   0x6   :  { %v903_v15 = vld [vmem:[%s1241_s0 + $0x30] sm:$0xff]  ;;  %v912_v16 = vld [vmem:[%s1240_s1 + $0x38] sm:$0xff]  ;;  %v926_v18 = vld [vmem:[%s1240_s1 + $0x40] sm:$0xff] }
   0x7   :  { %v917_v17 = vld [vmem:[%s1241_s0 + $0x38] sm:$0xff]  ;;  %v931_v19 = vld [vmem:[%s1241_s0 + $0x40] sm:$0xff]  ;;  %v940_v20 = vld [vmem:[%s1240_s1 + $0x48] sm:$0xff] }
   0x8   :  { %v945_v21 = vld [vmem:[%s1241_s0 + $0x48] sm:$0xff]  ;;  %v954_v22 = vld [vmem:[%s1240_s1 + $0x50] sm:$0xff]  ;;  %v968_v24 = vld [vmem:[%s1240_s1 + $0x58] sm:$0xff] }
   0x9   :  { %v959_v23 = vld [vmem:[%s1241_s0 + $0x50] sm:$0xff]  ;;  %v973_v25 = vld [vmem:[%s1241_s0 + $0x58] sm:$0xff]  ;;  %v982_v26 = vld [vmem:[%s1240_s1 + $0x60] sm:$0xff] }
   0xa   :  { %v987_v27 = vld [vmem:[%s1241_s0 + $0x60] sm:$0xff]  ;;  %v996_v28 = vld [vmem:[%s1240_s1 + $0x68] sm:$0xff]  ;;  %v24_v30 = vld [vmem:[%s1242_s3 + $0x18] sm:$0xff] }
   0xb   :  { %v1001_v29 = vld [vmem:[%s1241_s0 + $0x68] sm:$0xff]  ;;  %554 = vmatpush.msra.mxu3 %v24_v30  ;;  %v23_v31 = vld [vmem:[%s1242_s3 + $0x10] sm:$0xff]  ;;  %248 = vmatpush.msra.mxu1 %v24_v30  ;;  %v21_v33 = vld [vmem:[%s1242_s3] sm:$0xff] }
   0xc   :  { %v22_v32 = vld [vmem:[%s1242_s3 + $0x8] sm:$0xff]  ;;  %v1022_v34 = vld [vmem:[%s1240_s1 + $0x70] sm:$0xff]  ;;  %v1036_v36 = vld [vmem:[%s1240_s1 + $0x78] sm:$0xff] }
   0xd   :  { %680 = vmatmul.msk.f32.gmra.mxu2 %vm41_vm0, %v828_v4  ;;  %648 = vmatmul.msk.f32.gmra.mxu0 %vm41_vm0, %v833_v5  ;;  %v1027_v35 = vld [vmem:[%s1241_s0 + $0x70] sm:$0xff]  ;;  %v1041_v37 = vld [vmem:[%s1241_s0 + $0x78] sm:$0xff] }
   0xe   :  { %555 = vmatpush.msra.mxu3 %v23_v31  ;;  %249 = vmatpush.msra.mxu1 %v23_v31 }
  0x10   :  { %556 = vmatpush.msra.mxu3 %v22_v32  ;;  %250 = vmatpush.msra.mxu1 %v22_v32 }
  0x12   :  { %557 = vmatpush.msra.mxu3 %v21_v33  ;;  %251 = vmatpush.msra.mxu1 %v21_v33 }
  0x15   :  { %681 = vmatmul.msk.f32.gmra.mxu2 %vm41_vm0, %v842_v6  ;;  %649 = vmatmul.msk.f32.gmra.mxu0 %vm41_vm0, %v847_v7 }
  0x1d   :  { %682 = vmatmul.msk.f32.gmra.mxu2 %vm41_vm0, %v856_v8  ;;  %650 = vmatmul.msk.f32.gmra.mxu0 %vm41_vm0, %v861_v9 }
  0x25   :  { %683 = vmatmul.msk.f32.gmra.mxu2 %vm41_vm0, %v870_v10  ;;  %651 = vmatmul.msk.f32.gmra.mxu0 %vm41_vm0, %v875_v11 }
  0x2d   :  { %684 = vmatmul.msk.f32.gmra.mxu2 %vm41_vm0, %v884_v12  ;;  %652 = vmatmul.msk.f32.gmra.mxu0 %vm41_vm0, %v889_v13 }
  0x35   :  { %685 = vmatmul.msk.f32.gmra.mxu2 %vm41_vm0, %v898_v14  ;;  %653 = vmatmul.msk.f32.gmra.mxu0 %vm41_vm0, %v903_v15 }
  0x3d   :  { %686 = vmatmul.msk.f32.gmra.mxu2 %vm41_vm0, %v912_v16  ;;  %654 = vmatmul.msk.f32.gmra.mxu0 %vm41_vm0, %v917_v17 }
  0x45   :  { %687 = vmatmul.msk.f32.gmra.mxu2 %vm41_vm0, %v926_v18  ;;  %655 = vmatmul.msk.f32.gmra.mxu0 %vm41_vm0, %v931_v19 }
  0x4d   :  { %688 = vmatmul.msk.f32.gmra.mxu2 %vm41_vm0, %v940_v20  ;;  %656 = vmatmul.msk.f32.gmra.mxu0 %vm41_vm0, %v945_v21 }
  0x55   :  { %689 = vmatmul.msk.f32.gmra.mxu2 %vm41_vm0, %v954_v22  ;;  %657 = vmatmul.msk.f32.gmra.mxu0 %vm41_vm0, %v959_v23 }
  0x5d   :  { %690 = vmatmul.msk.f32.gmra.mxu2 %vm41_vm0, %v968_v24  ;;  %658 = vmatmul.msk.f32.gmra.mxu0 %vm41_vm0, %v973_v25 }
  0x65   :  { %691 = vmatmul.msk.f32.gmra.mxu2 %vm41_vm0, %v982_v26  ;;  %659 = vmatmul.msk.f32.gmra.mxu0 %vm41_vm0, %v987_v27 }
  0x6d   :  { %692 = vmatmul.msk.f32.gmra.mxu2 %vm41_vm0, %v996_v28  ;;  %660 = vmatmul.msk.f32.gmra.mxu0 %vm41_vm0, %v1001_v29 }
  0x75   :  { %693 = vmatmul.msk.f32.gmra.mxu2 %vm41_vm0, %v1022_v34  ;;  %661 = vmatmul.msk.f32.gmra.mxu0 %vm41_vm0, %v1027_v35 }
  0x7d   :  { %694 = vmatmul.msk.f32.gmra.mxu2 %vm41_vm0, %v1036_v36  ;;  %662 = vmatmul.msk.f32.gmra.mxu0 %vm41_vm0, %v1041_v37 }
  0x82   :  { %v107_v38 = vpop.f32.mrf.mxu0 }
  0x83   :  { %v155_v39 = vmul.f32 1.442695, %v107_v38 }
  0x85   :  { %711 = vpow2.f32 %v155_v39 }
  0x88   :  { %v414_v40 = vpop.f32.mrf.mxu2 }
  0x89   :  { %v462_v41 = vmul.f32 1.442695, %v414_v40 }
  0x8a   :  { %v110_v42 = vpop.f32.mrf.mxu0 }
  0x8b   :  { %v712_v43 = vpop.eup %711  ;;  %713 = vpow2.f32 %v462_v41  ;;  %v157_v44 = vmul.f32 1.442695, %v110_v42 }
  0x8c   :  { %663 = vmatmul.msk.f32.vlgmr.msra.gmra.mxu1 %vm187_vm1, %v712_v43 }
  0x8d   :  { %715 = vpow2.f32 %v157_v44 }
  0x90   :  { %v417_v45 = vpop.f32.mrf.mxu2 }
  0x91   :  { %v714_v46 = vpop.eup %713  ;;  %v464_v47 = vmul.f32 1.442695, %v417_v45 }
  0x92   :  { %695 = vmatmul.msk.f32.vlgmr.msra.gmra.mxu3 %vm187_vm1, %v714_v46  ;;  %v113_v48 = vpop.f32.mrf.mxu0 }
  0x93   :  { %v716_v49 = vpop.eup %715  ;;  %717 = vpow2.f32 %v464_v47  ;;  %v159_v50 = vmul.f32 1.442695, %v113_v48 }
  0x94   :  { %664 = vmatmul.msk.f32.gmra.mxu1 %vm187_vm1, %v716_v49 }
  0x95   :  { %719 = vpow2.f32 %v159_v50 }
  0x98   :  { %v420_v51 = vpop.f32.mrf.mxu2 }
  0x99   :  { %v718_v52 = vpop.eup %717  ;;  %v466_v53 = vmul.f32 1.442695, %v420_v51 }
  0x9a   :  { %696 = vmatmul.msk.f32.gmra.mxu3 %vm187_vm1, %v718_v52  ;;  %v116_v54 = vpop.f32.mrf.mxu0 }
  0x9b   :  { %v720_v55 = vpop.eup %719  ;;  %721 = vpow2.f32 %v466_v53  ;;  %v161_v56 = vmul.f32 1.442695, %v116_v54 }
  0x9c   :  { %665 = vmatmul.msk.f32.gmra.mxu1 %vm187_vm1, %v720_v55 }
  0x9d   :  { %723 = vpow2.f32 %v161_v56 }
  0xa0   :  { %v423_v57 = vpop.f32.mrf.mxu2 }
  0xa1   :  { %v722_v58 = vpop.eup %721  ;;  %v468_v59 = vmul.f32 1.442695, %v423_v57 }
  0xa2   :  { %697 = vmatmul.msk.f32.gmra.mxu3 %vm187_vm1, %v722_v58  ;;  %v119_v60 = vpop.f32.mrf.mxu0 }
  0xa3   :  { %v724_v61 = vpop.eup %723  ;;  %725 = vpow2.f32 %v468_v59  ;;  %v163_v62 = vmul.f32 1.442695, %v119_v60 }
  0xa4   :  { %666 = vmatmul.msk.f32.gmra.mxu1 %vm187_vm1, %v724_v61 }
  0xa5   :  { %727 = vpow2.f32 %v163_v62 }
  0xa8   :  { %v426_v63 = vpop.f32.mrf.mxu2 }
  0xa9   :  { %v726_v0 = vpop.eup %725  ;;  %v470_v1 = vmul.f32 1.442695, %v426_v63 }
  0xaa   :  { %698 = vmatmul.msk.f32.gmra.mxu3 %vm187_vm1, %v726_v0  ;;  %v122_v30 = vpop.f32.mrf.mxu0 }
  0xab   :  { %v728_v31 = vpop.eup %727  ;;  %729 = vpow2.f32 %v470_v1  ;;  %v165_v32 = vmul.f32 1.442695, %v122_v30 }
  0xac   :  { %667 = vmatmul.msk.f32.gmra.mxu1 %vm187_vm1, %v728_v31 }
  0xad   :  { %731 = vpow2.f32 %v165_v32 }
  0xb0   :  { %v429_v33 = vpop.f32.mrf.mxu2 }
  0xb1   :  { %v730_v38 = vpop.eup %729  ;;  %v472_v39 = vmul.f32 1.442695, %v429_v33 }
  0xb2   :  { %699 = vmatmul.msk.f32.gmra.mxu3 %vm187_vm1, %v730_v38  ;;  %v125_v40 = vpop.f32.mrf.mxu0 }
  0xb3   :  { %v732_v41 = vpop.eup %731  ;;  %733 = vpow2.f32 %v472_v39  ;;  %v167_v42 = vmul.f32 1.442695, %v125_v40 }
  0xb4   :  { %668 = vmatmul.msk.f32.gmra.mxu1 %vm187_vm1, %v732_v41 }
  0xb5   :  { %735 = vpow2.f32 %v167_v42 }
  0xb8   :  { %v432_v43 = vpop.f32.mrf.mxu2 }
  0xb9   :  { %v734_v44 = vpop.eup %733  ;;  %v474_v45 = vmul.f32 1.442695, %v432_v43 }
  0xba   :  { %700 = vmatmul.msk.f32.gmra.mxu3 %vm187_vm1, %v734_v44  ;;  %v128_v46 = vpop.f32.mrf.mxu0 }
  0xbb   :  { %v736_v47 = vpop.eup %735  ;;  %737 = vpow2.f32 %v474_v45  ;;  %v169_v48 = vmul.f32 1.442695, %v128_v46 }
  0xbc   :  { %669 = vmatmul.msk.f32.gmra.mxu1 %vm187_vm1, %v736_v47 }
  0xbd   :  { %739 = vpow2.f32 %v169_v48 }
  0xc0   :  { %v435_v49 = vpop.f32.mrf.mxu2 }
  0xc1   :  { %v738_v50 = vpop.eup %737  ;;  %v476_v51 = vmul.f32 1.442695, %v435_v49 }
  0xc2   :  { %701 = vmatmul.msk.f32.gmra.mxu3 %vm187_vm1, %v738_v50  ;;  %v131_v52 = vpop.f32.mrf.mxu0 }
  0xc3   :  { %v740_v53 = vpop.eup %739  ;;  %741 = vpow2.f32 %v476_v51  ;;  %v171_v54 = vmul.f32 1.442695, %v131_v52 }
  0xc4   :  { %670 = vmatmul.msk.f32.gmra.mxu1 %vm187_vm1, %v740_v53 }
  0xc5   :  { %743 = vpow2.f32 %v171_v54 }
  0xc8   :  { %v438_v55 = vpop.f32.mrf.mxu2 }
  0xc9   :  { %v742_v56 = vpop.eup %741  ;;  %v478_v57 = vmul.f32 1.442695, %v438_v55 }
  0xca   :  { %702 = vmatmul.msk.f32.gmra.mxu3 %vm187_vm1, %v742_v56  ;;  %v134_v58 = vpop.f32.mrf.mxu0 }
  0xcb   :  { %v744_v59 = vpop.eup %743  ;;  %745 = vpow2.f32 %v478_v57  ;;  %v173_v60 = vmul.f32 1.442695, %v134_v58 }
  0xcc   :  { %671 = vmatmul.msk.f32.gmra.mxu1 %vm187_vm1, %v744_v59 }
  0xcd   :  { %747 = vpow2.f32 %v173_v60 }
  0xd0   :  { %v441_v61 = vpop.f32.mrf.mxu2 }
  0xd1   :  { %v746_v62 = vpop.eup %745  ;;  %v480_v63 = vmul.f32 1.442695, %v441_v61 }
  0xd2   :  { %703 = vmatmul.msk.f32.gmra.mxu3 %vm187_vm1, %v746_v62  ;;  %v137_v0 = vpop.f32.mrf.mxu0 }
  0xd3   :  { %v748_v1 = vpop.eup %747  ;;  %749 = vpow2.f32 %v480_v63  ;;  %v175_v30 = vmul.f32 1.442695, %v137_v0 }
  0xd4   :  { %672 = vmatmul.msk.f32.gmra.mxu1 %vm187_vm1, %v748_v1 }
  0xd5   :  { %751 = vpow2.f32 %v175_v30 }
  0xd8   :  { %v444_v31 = vpop.f32.mrf.mxu2 }
  0xd9   :  { %v750_v32 = vpop.eup %749  ;;  %v482_v33 = vmul.f32 1.442695, %v444_v31 }
  0xda   :  { %704 = vmatmul.msk.f32.gmra.mxu3 %vm187_vm1, %v750_v32  ;;  %v140_v38 = vpop.f32.mrf.mxu0 }
  0xdb   :  { %v752_v39 = vpop.eup %751  ;;  %753 = vpow2.f32 %v482_v33  ;;  %v177_v40 = vmul.f32 1.442695, %v140_v38 }
  0xdc   :  { %673 = vmatmul.msk.f32.gmra.mxu1 %vm187_vm1, %v752_v39 }
  0xdd   :  { %755 = vpow2.f32 %v177_v40 }
  0xe0   :  { %v447_v41 = vpop.f32.mrf.mxu2 }
  0xe1   :  { %v754_v42 = vpop.eup %753  ;;  %v484_v43 = vmul.f32 1.442695, %v447_v41 }
  0xe2   :  { %705 = vmatmul.msk.f32.gmra.mxu3 %vm187_vm1, %v754_v42  ;;  %v143_v44 = vpop.f32.mrf.mxu0 }
  0xe3   :  { %v756_v45 = vpop.eup %755  ;;  %757 = vpow2.f32 %v484_v43  ;;  %v179_v46 = vmul.f32 1.442695, %v143_v44 }
  0xe4   :  { %674 = vmatmul.msk.f32.gmra.mxu1 %vm187_vm1, %v756_v45 }
  0xe5   :  { %759 = vpow2.f32 %v179_v46 }
  0xe8   :  { %v450_v47 = vpop.f32.mrf.mxu2 }
  0xe9   :  { %v758_v48 = vpop.eup %757  ;;  %v486_v49 = vmul.f32 1.442695, %v450_v47 }
  0xea   :  { %706 = vmatmul.msk.f32.gmra.mxu3 %vm187_vm1, %v758_v48  ;;  %v146_v50 = vpop.f32.mrf.mxu0 }
  0xeb   :  { %v760_v51 = vpop.eup %759  ;;  %761 = vpow2.f32 %v486_v49  ;;  %v181_v52 = vmul.f32 1.442695, %v146_v50 }
  0xec   :  { %675 = vmatmul.msk.f32.gmra.mxu1 %vm187_vm1, %v760_v51 }
  0xed   :  { %763 = vpow2.f32 %v181_v52 }
  0xf0   :  { %v453_v53 = vpop.f32.mrf.mxu2 }
  0xf1   :  { %v762_v54 = vpop.eup %761  ;;  %v488_v55 = vmul.f32 1.442695, %v453_v53 }
  0xf2   :  { %707 = vmatmul.msk.f32.gmra.mxu3 %vm187_vm1, %v762_v54  ;;  %v149_v56 = vpop.f32.mrf.mxu0 }
  0xf3   :  { %v764_v57 = vpop.eup %763  ;;  %765 = vpow2.f32 %v488_v55  ;;  %v183_v58 = vmul.f32 1.442695, %v149_v56 }
  0xf4   :  { %676 = vmatmul.msk.f32.gmra.mxu1 %vm187_vm1, %v764_v57 }
  0xf5   :  { %767 = vpow2.f32 %v183_v58 }
  0xf8   :  { %v456_v59 = vpop.f32.mrf.mxu2 }
  0xf9   :  { %v766_v60 = vpop.eup %765  ;;  %v490_v61 = vmul.f32 1.442695, %v456_v59 }
  0xfa   :  { %708 = vmatmul.msk.f32.gmra.mxu3 %vm187_vm1, %v766_v60  ;;  %v152_v62 = vpop.f32.mrf.mxu0 }
  0xfb   :  { %v768_v63 = vpop.eup %767  ;;  %769 = vpow2.f32 %v490_v61  ;;  %v185_v0 = vmul.f32 1.442695, %v152_v62 }
  0xfc   :  { %677 = vmatmul.msk.f32.gmra.mxu1 %vm187_vm1, %v768_v63 }
  0xfd   :  { %771 = vpow2.f32 %v185_v0 }
 0x100   :  { %v459_v1 = vpop.f32.mrf.mxu2 }
 0x101   :  { %v770_v30 = vpop.eup %769  ;;  %v492_v31 = vmul.f32 1.442695, %v459_v1 }
 0x102   :  { %709 = vmatmul.msk.f32.gmra.mxu3 %vm187_vm1, %v770_v30 }
 0x103   :  { %v772_v32 = vpop.eup %771  ;;  %773 = vpow2.f32 %v492_v31 }
 0x104   :  { %678 = vmatmul.msk.f32.gmra.mxu1 %vm187_vm1, %v772_v32 }
 0x109   :  { %v774_v33 = vpop.eup %773  ;;  %v253_v38 = vpop.f32.mrf.mxu1 }
 0x10a   :  { %710 = vmatmul.msk.f32.gmra.mxu3 %vm187_vm1, %v774_v33  ;;  %v301_v39 = vadd.f32 %v253_v38, %v819_v3 }
 0x10c   :  { %317 = vst.msk [vmem:[%s1243_s4] sm:$0xff] %vm41_vm0, %v301_v39 }
 0x111   :  { %v256_v40 = vpop.f32.mrf.mxu1 }
 0x112   :  { %v302_v41 = vadd.f32 %v256_v40, %v833_v5 }
 0x114   :  { %318 = vst.msk [vmem:[%s1243_s4 + $0x8] sm:$0xff] %vm41_vm0, %v302_v41 }
 0x115   :  { %v559_v42 = vpop.f32.mrf.mxu3 }
 0x116   :  { %v607_v43 = vadd.f32 %v559_v42, %v814_v2 }
 0x118   :  { %623 = vst.msk [vmem:[%s1244_s5] sm:$0xff] %vm41_vm0, %v607_v43 }
 0x119   :  { %v259_v3 = vpop.f32.mrf.mxu1 }
 0x11a   :  { %v303_v44 = vadd.f32 %v259_v3, %v847_v7 }
 0x11c   :  { %319 = vst.msk [vmem:[%s1243_s4 + $0x10] sm:$0xff] %vm41_vm0, %v303_v44 }
 0x11d   :  { %v562_v5 = vpop.f32.mrf.mxu3 }
 0x11e   :  { %v608_v45 = vadd.f32 %v562_v5, %v828_v4 }
 0x120   :  { %624 = vst.msk [vmem:[%s1244_s5 + $0x8] sm:$0xff] %vm41_vm0, %v608_v45 }
 0x121   :  { %v262_v2 = vpop.f32.mrf.mxu1 }
 0x122   :  { %v304_v46 = vadd.f32 %v262_v2, %v861_v9 }
 0x124   :  { %320 = vst.msk [vmem:[%s1243_s4 + $0x18] sm:$0xff] %vm41_vm0, %v304_v46 }
 0x125   :  { %v565_v7 = vpop.f32.mrf.mxu3 }
 0x126   :  { %v609_v47 = vadd.f32 %v565_v7, %v842_v6 }
 0x128   :  { %625 = vst.msk [vmem:[%s1244_s5 + $0x10] sm:$0xff] %vm41_vm0, %v609_v47 }
 0x129   :  { %v265_v4 = vpop.f32.mrf.mxu1 }
 0x12a   :  { %v305_v48 = vadd.f32 %v265_v4, %v875_v11 }
 0x12c   :  { %321 = vst.msk [vmem:[%s1243_s4 + $0x20] sm:$0xff] %vm41_vm0, %v305_v48 }
 0x12d   :  { %v568_v9 = vpop.f32.mrf.mxu3 }
 0x12e   :  { %v610_v49 = vadd.f32 %v568_v9, %v856_v8 }
 0x130   :  { %626 = vst.msk [vmem:[%s1244_s5 + $0x18] sm:$0xff] %vm41_vm0, %v610_v49 }
 0x131   :  { %v268_v6 = vpop.f32.mrf.mxu1 }
 0x132   :  { %v306_v50 = vadd.f32 %v268_v6, %v889_v13 }
 0x134   :  { %322 = vst.msk [vmem:[%s1243_s4 + $0x28] sm:$0xff] %vm41_vm0, %v306_v50 }
 0x135   :  { %v571_v11 = vpop.f32.mrf.mxu3 }
 0x136   :  { %v611_v51 = vadd.f32 %v571_v11, %v870_v10 }
 0x138   :  { %627 = vst.msk [vmem:[%s1244_s5 + $0x20] sm:$0xff] %vm41_vm0, %v611_v51 }
 0x139   :  { %v271_v8 = vpop.f32.mrf.mxu1 }
 0x13a   :  { %v307_v52 = vadd.f32 %v271_v8, %v903_v15 }
 0x13c   :  { %323 = vst.msk [vmem:[%s1243_s4 + $0x30] sm:$0xff] %vm41_vm0, %v307_v52 }
 0x13d   :  { %v574_v13 = vpop.f32.mrf.mxu3 }
 0x13e   :  { %v612_v53 = vadd.f32 %v574_v13, %v884_v12 }
 0x140   :  { %628 = vst.msk [vmem:[%s1244_s5 + $0x28] sm:$0xff] %vm41_vm0, %v612_v53 }
 0x141   :  { %v274_v10 = vpop.f32.mrf.mxu1 }
 0x142   :  { %v308_v54 = vadd.f32 %v274_v10, %v917_v17 }
 0x144   :  { %324 = vst.msk [vmem:[%s1243_s4 + $0x38] sm:$0xff] %vm41_vm0, %v308_v54 }
 0x145   :  { %v577_v15 = vpop.f32.mrf.mxu3 }
 0x146   :  { %v613_v55 = vadd.f32 %v577_v15, %v898_v14 }
 0x148   :  { %629 = vst.msk [vmem:[%s1244_s5 + $0x30] sm:$0xff] %vm41_vm0, %v613_v55 }
 0x149   :  { %v277_v12 = vpop.f32.mrf.mxu1 }
 0x14a   :  { %v309_v56 = vadd.f32 %v277_v12, %v931_v19 }
 0x14c   :  { %325 = vst.msk [vmem:[%s1243_s4 + $0x40] sm:$0xff] %vm41_vm0, %v309_v56 }
 0x14d   :  { %v580_v17 = vpop.f32.mrf.mxu3 }
 0x14e   :  { %v614_v57 = vadd.f32 %v580_v17, %v912_v16 }
 0x150   :  { %630 = vst.msk [vmem:[%s1244_s5 + $0x38] sm:$0xff] %vm41_vm0, %v614_v57 }
 0x151   :  { %v280_v14 = vpop.f32.mrf.mxu1 }
 0x152   :  { %v310_v58 = vadd.f32 %v280_v14, %v945_v21 }
 0x154   :  { %326 = vst.msk [vmem:[%s1243_s4 + $0x48] sm:$0xff] %vm41_vm0, %v310_v58 }
 0x155   :  { %v583_v19 = vpop.f32.mrf.mxu3 }
 0x156   :  { %v615_v59 = vadd.f32 %v583_v19, %v926_v18 }
 0x158   :  { %631 = vst.msk [vmem:[%s1244_s5 + $0x40] sm:$0xff] %vm41_vm0, %v615_v59 }
 0x159   :  { %v283_v16 = vpop.f32.mrf.mxu1 }
 0x15a   :  { %v311_v60 = vadd.f32 %v283_v16, %v959_v23 }
 0x15c   :  { %327 = vst.msk [vmem:[%s1243_s4 + $0x50] sm:$0xff] %vm41_vm0, %v311_v60 }
 0x15d   :  { %v586_v21 = vpop.f32.mrf.mxu3 }
 0x15e   :  { %v616_v61 = vadd.f32 %v586_v21, %v940_v20 }
 0x160   :  { %632 = vst.msk [vmem:[%s1244_s5 + $0x48] sm:$0xff] %vm41_vm0, %v616_v61 }
 0x161   :  { %v286_v18 = vpop.f32.mrf.mxu1 }
 0x162   :  { %v312_v62 = vadd.f32 %v286_v18, %v973_v25 }
 0x164   :  { %328 = vst.msk [vmem:[%s1243_s4 + $0x58] sm:$0xff] %vm41_vm0, %v312_v62 }
 0x165   :  { %v589_v23 = vpop.f32.mrf.mxu3 }
 0x166   :  { %v617_v63 = vadd.f32 %v589_v23, %v954_v22 }
 0x168   :  { %633 = vst.msk [vmem:[%s1244_s5 + $0x50] sm:$0xff] %vm41_vm0, %v617_v63 }
 0x169   :  { %v289_v20 = vpop.f32.mrf.mxu1 }
 0x16a   :  { %v313_v0 = vadd.f32 %v289_v20, %v987_v27 }
 0x16c   :  { %329 = vst.msk [vmem:[%s1243_s4 + $0x60] sm:$0xff] %vm41_vm0, %v313_v0 }
 0x16d   :  { %v592_v25 = vpop.f32.mrf.mxu3 }
 0x16e   :  { %v618_v1 = vadd.f32 %v592_v25, %v968_v24 }
 0x170   :  { %634 = vst.msk [vmem:[%s1244_s5 + $0x58] sm:$0xff] %vm41_vm0, %v618_v1 }
 0x171   :  { %v292_v22 = vpop.f32.mrf.mxu1 }
 0x172   :  { %v314_v30 = vadd.f32 %v292_v22, %v1001_v29 }
 0x174   :  { %330 = vst.msk [vmem:[%s1243_s4 + $0x68] sm:$0xff] %vm41_vm0, %v314_v30 }
 0x175   :  { %v595_v27 = vpop.f32.mrf.mxu3 }
 0x176   :  { %v619_v31 = vadd.f32 %v595_v27, %v982_v26 }
 0x178   :  { %635 = vst.msk [vmem:[%s1244_s5 + $0x60] sm:$0xff] %vm41_vm0, %v619_v31 }
 0x179   :  { %v295_v24 = vpop.f32.mrf.mxu1 }
 0x17a   :  { %v315_v32 = vadd.f32 %v295_v24, %v1027_v35 }
 0x17c   :  { %331 = vst.msk [vmem:[%s1243_s4 + $0x70] sm:$0xff] %vm41_vm0, %v315_v32 }
 0x17d   :  { %v598_v29 = vpop.f32.mrf.mxu3 }
 0x17e   :  { %v620_v33 = vadd.f32 %v598_v29, %v996_v28 }
 0x180   :  { %636 = vst.msk [vmem:[%s1244_s5 + $0x68] sm:$0xff] %vm41_vm0, %v620_v33 }
 0x181   :  { %v298_v26 = vpop.f32.mrf.mxu1 }
 0x182   :  { %v316_v38 = vadd.f32 %v298_v26, %v1041_v37 }
 0x184   :  { %332 = vst.msk [vmem:[%s1243_s4 + $0x78] sm:$0xff] %vm41_vm0, %v316_v38 }
 0x185   :  { %v601_v35 = vpop.f32.mrf.mxu3 }
 0x186   :  { %v621_v39 = vadd.f32 %v601_v35, %v1022_v34 }
 0x188   :  { %637 = vst.msk [vmem:[%s1244_s5 + $0x70] sm:$0xff] %vm41_vm0, %v621_v39 }
 0x18d   :  { %v604_v28 = vpop.f32.mrf.mxu3 }
 0x18e   :  { %v622_v40 = vadd.f32 %v604_v28, %v1036_v36 }
 0x190   :  { %638 = vst.msk [vmem:[%s1244_s5 + $0x78] sm:$0xff] %vm41_vm0, %v622_v40 }

</bundles_post_ra>
